<compile_context>
chip_gen: v5e
topology: v5e:2x2
jax: 0.10.0
libtpu: 0.0.40
codegen_flags: <defaults>
</compile_context>

<pallas_src>
import functools

import jax
import jax.numpy as jnp
from jax.experimental import pallas as pl
from jax.experimental.pallas import tpu as pltpu


# ---------------------------------------------------------------------------
# Kernel
# ---------------------------------------------------------------------------
def _macro_soft_f05_kernel(y_ref, logit_ref, cost_ref,
                           tp_acc, sy_acc, syh_acc,
                           *, batch, tile_b):
    b = pl.program_id(1)                     # batch (reduction) axis, innermost
    last_b = pl.num_programs(1) - 1

    @pl.when(b == 0)
    def _init():
        tp_acc[...] = jnp.zeros_like(tp_acc)
        sy_acc[...] = jnp.zeros_like(sy_acc)
        syh_acc[...] = jnp.zeros_like(syh_acc)

    y = y_ref[...].astype(jnp.float32)
    logit = logit_ref[...].astype(jnp.float32)
    # sigmoid(x) = 0.5 * tanh(0.5 * x) + 0.5  -- single EUP op (separate
    # bundle slot) instead of EUP exp plus VALU negate/add/divide.
    y_hat = 0.5 * jnp.tanh(0.5 * logit) + 0.5

    def _accumulate(yv, yhv):
        # Lane-dense (1, tn) partial sums over the rows of this tile.
        tp_acc[...] += jnp.sum(yhv * yv, axis=0, keepdims=True)
        sy_acc[...] += jnp.sum(yv, axis=0, keepdims=True)
        syh_acc[...] += jnp.sum(yhv, axis=0, keepdims=True)

    rem = batch % tile_b
    if rem == 0:
        _accumulate(y, y_hat)
    else:
        # Only the tail block pays for masking; interior blocks stay lean.
        @pl.when(b < last_b)
        def _interior():
            _accumulate(y, y_hat)

        @pl.when(b == last_b)
        def _tail():
            row = jax.lax.broadcasted_iota(jnp.int32, y.shape, 0)
            valid = row < rem
            _accumulate(jnp.where(valid, y, 0.0),
                        jnp.where(valid, y_hat, 0.0))

    @pl.when(b == last_b)
    def _finalize():
        tp = tp_acc[...]
        # fp + fn = (sum_yhat - tp) + (sum_y - tp)
        # denom   = 0.5*tp + fp + fn + eps = sum_y + sum_yhat - 1.5*tp + eps
        denom = sy_acc[...] + syh_acc[...] - 1.5 * tp + 1e-16
        soft_f0_5 = 1.25 * tp / denom
        cost_ref[...] = (1.0 - soft_f0_5).astype(cost_ref.dtype)


# ---------------------------------------------------------------------------
# Hardware-aware sizing helpers
# ---------------------------------------------------------------------------
def _tpu_info():
    try:
        return pltpu.get_tpu_info()
    except Exception:
        return None


def _phys_vmem_bytes(info):
    if info is not None:
        v = getattr(info, "vmem_capacity_bytes", None)
        if v:
            return int(v)
    return 128 * 1024 * 1024  # v5e/v6e default


def _is_multi_tensorcore(info, phys_vmem_bytes):
    # Prefer an explicit core count if the runtime exposes one.
    if info is not None:
        for name in ("num_tensorcores", "tensorcore_count", "num_cores",
                     "core_count"):
            v = getattr(info, name, None)
            if isinstance(v, int) and v > 0:
                return v > 1
    # Heuristic: v7x-class chips (2 TCs/chip) have 64 MiB VMEM per TC;
    # v5e/v6e (1 TC) have 128 MiB.
    return phys_vmem_bytes <= 64 * 1024 * 1024


def _vmem_limit(phys_vmem_bytes):
    # Generation-aware scoped-VMEM limit, leaving compiler headroom.
    if phys_vmem_bytes <= 64 * 1024 * 1024:      # v7x-class
        return 44 * 1024 * 1024
    return 56 * 1024 * 1024                      # v5e / v6e


def _pick_label_tile(n_labels, multi_core):
    # Full-row blocks keep each row's DMA contiguous.  Split the label axis
    # only when a second TensorCore can take the other half (v7x megacore)
    # and each half stays >= 256 labels wide (128-aligned).
    if multi_core and n_labels >= 512 and n_labels % 256 == 0:
        return n_labels // 2
    # TODO(synk): for v7x with small / unaligned N, add a leading size-2
    # parallel batch axis emitting (2, N) partial sums combined in JAX.
    return n_labels


def _pick_batch_tile(batch, tn, vmem_limit_bytes):
    # Per pipeline step: bf16 targets (2 B) + f32 logits (4 B) per element of
    # the (tb, tn) block.  Target ~8 MiB of combined input per step (double
    # buffered -> ~16 MiB of pipeline VMEM), capped well under the scoped
    # VMEM limit.
    bytes_per_row = tn * 6
    step_budget = min(8 * 1024 * 1024, (2 * vmem_limit_bytes) // 5)
    max_rows = max(16, step_budget // max(bytes_per_row, 1))
    tb = min(batch, 2048, max_rows)
    if tb < batch:
        tb = max(16, (tb // 16) * 16)   # sublane alignment (safe for bf16)
    return tb


# ---------------------------------------------------------------------------
# Public wrapper
# ---------------------------------------------------------------------------
def macro_soft_f05_loss(y, logit, *, tile_b=None, tile_n=None):
    """y: (B, N) int targets (0/1); logit: (B, N) float logits. Returns scalar f32."""
    assert y.shape == logit.shape and y.ndim == 2
    batch, n_labels = y.shape

    info = _tpu_info()
    phys_vmem = _phys_vmem_bytes(info)
    multi_core = _is_multi_tensorcore(info, phys_vmem)
    vmem_limit = _vmem_limit(phys_vmem)

    tn = tile_n if tile_n is not None else _pick_label_tile(n_labels, multi_core)
    assert n_labels % tn == 0, "label tile must divide N"
    tb = tile_b if tile_b is not None else _pick_batch_tile(batch, tn, vmem_limit)
    tb = min(tb, batch)

    n_batch_blocks = pl.cdiv(batch, tb)
    n_label_blocks = n_labels // tn

    # 0/1 targets are exact in bf16 -> halves target HBM traffic.
    y_bf16 = y.astype(jnp.bfloat16)
    logit_f32 = logit.astype(jnp.float32)

    kernel = functools.partial(_macro_soft_f05_kernel, batch=batch, tile_b=tb)

    per_label_cost = pl.pallas_call(
        kernel,
        out_shape=jax.ShapeDtypeStruct((1, n_labels), jnp.float32),
        grid_spec=pltpu.PrefetchScalarGridSpec(
            num_scalar_prefetch=0,
            grid=(n_label_blocks, n_batch_blocks),   # reduction axis last
            in_specs=[
                pl.BlockSpec((tb, tn), lambda l, b: (b, l)),  # y   (bf16)
                pl.BlockSpec((tb, tn), lambda l, b: (b, l)),  # logit (f32)
            ],
            out_specs=pl.BlockSpec((1, tn), lambda l, b: (0, l)),
            scratch_shapes=[
                pltpu.VMEM((1, tn), jnp.float32),  # tp accumulator
                pltpu.VMEM((1, tn), jnp.float32),  # sum(y) accumulator
                pltpu.VMEM((1, tn), jnp.float32),  # sum(y_hat) accumulator
            ],
        ),
        compiler_params=pltpu.CompilerParams(
            dimension_semantics=("parallel", "arbitrary"),
            vmem_limit_bytes=vmem_limit,
        ),
    )(y_bf16, logit_f32)

    # Macro average over labels (tiny, done in JAX).
    return jnp.mean(per_label_cost)


# ---------------------------------------------------------------------------
# Pure-JAX reference (matches the PyTorch module)
# ---------------------------------------------------------------------------
def _reference(y, logit):
    y = y.astype(jnp.float32)
    y_hat = jax.nn.sigmoid(logit.astype(jnp.float32))
    tp = (y_hat * y).sum(axis=0)
    fp = (y_hat * (1.0 - y)).sum(axis=0)
    fn = ((1.0 - y_hat) * y).sum(axis=0)
    soft = 1.25 * tp / (0.25 * 2.0 * tp + fn + fp + 1e-16)
    return (1.0 - soft).mean()


if __name__ == "__main__":
    key = jax.random.PRNGKey(0)
    k1, k2, k3, k4 = jax.random.split(key, 4)

    # Small case (matches the module spec): single block each way.
    BATCH, N_LABELS = 8, 16
    y = jax.random.bernoulli(k1, p=0.4, shape=(BATCH, N_LABELS)).astype(jnp.int32)
    logit = jax.random.normal(k2, (BATCH, N_LABELS), dtype=jnp.float32)

    loss = macro_soft_f05_loss(y, logit)
    jax.block_until_ready(loss)
    ref = _reference(y, logit)
    assert jnp.allclose(loss, ref, atol=1e-5, rtol=1e-5), (loss, ref)

    # Larger case: auto-sized tiles (typically one big batch block).
    B2, N2 = 600, 256
    y2 = jax.random.bernoulli(k3, p=0.3, shape=(B2, N2)).astype(jnp.int32)
    logit2 = jax.random.normal(k4, (B2, N2), dtype=jnp.float32)

    loss2 = macro_soft_f05_loss(y2, logit2)
    jax.block_until_ready(loss2)
    ref2 = _reference(y2, logit2)
    assert jnp.allclose(loss2, ref2, atol=1e-4, rtol=1e-4), (loss2, ref2)

    # Same data with forced small tiles: exercises the batch-tiled reduction
    # grid (5 blocks), the gated tail-row masking (600 % 128 != 0) and the
    # label-blocked parallel axis (2 blocks).
    loss3 = macro_soft_f05_loss(y2, logit2, tile_b=128, tile_n=128)
    jax.block_until_ready(loss3)
    assert jnp.allclose(loss3, ref2, atol=1e-4, rtol=1e-4), (loss3, ref2)

    print("KERNEL_OK")
</pallas_src>

<mosaic_0001>
module attributes {stable_mosaic.version = 11 : i64} {
  func.func @_macro_soft_f05_kernel(%arg0: i32, %arg1: i32, %arg2: memref<8x16xbf16, #tpu.memory_space<vmem>>, %arg3: memref<8x16xf32, #tpu.memory_space<vmem>>, %arg4: memref<1x16xf32, #tpu.memory_space<vmem>>, %arg5: memref<1x16xf32, #tpu.memory_space<vmem>>, %arg6: memref<1x16xf32, #tpu.memory_space<vmem>>, %arg7: memref<1x16xf32, #tpu.memory_space<vmem>>) attributes {dimension_semantics = [#tpu.dimension_semantics<parallel>, #tpu.dimension_semantics<arbitrary>], iteration_bounds = array<i64: 1, 1>, scalar_prefetch = 0 : i64, scratch_operands = 3 : i64, tpu.core_type = #tpu.core_type<tc>, window_params = [{transform_indices = @transform_0, window_bounds = array<i64: 8, 16>}, {transform_indices = @transform_1, window_bounds = array<i64: 8, 16>}, {transform_indices = @transform_2, window_bounds = array<i64: 1, 16>}]} {
    %c0_i32 = arith.constant 0 : i32
    %0 = arith.cmpi eq, %arg1, %c0_i32 : i32
    %1 = arith.extui %0 : i1 to i32
    %c0_i32_0 = arith.constant 0 : i32
    %2 = arith.cmpi ne, %1, %c0_i32_0 : i32
    scf.if %2 {
      %cst_23 = arith.constant 0.000000e+00 : f32
      %32 = vector.broadcast %cst_23 : f32 to vector<1x16xf32>
      %c0_24 = arith.constant 0 : index
      %c0_25 = arith.constant 0 : index
      %33 = vector.load %arg5[%c0_24, %c0_25] : memref<1x16xf32, #tpu.memory_space<vmem>>, vector<1x16xf32>
      tpu.vector_store %arg5[%c0_24, %c0_25], %32 {strides = array<i32>} : memref<1x16xf32, #tpu.memory_space<vmem>>, vector<1x16xf32>,
      %cst_26 = arith.constant 0.000000e+00 : f32
      %34 = vector.broadcast %cst_26 : f32 to vector<1x16xf32>
      %c0_27 = arith.constant 0 : index
      %c0_28 = arith.constant 0 : index
      %35 = vector.load %arg6[%c0_27, %c0_28] : memref<1x16xf32, #tpu.memory_space<vmem>>, vector<1x16xf32>
      tpu.vector_store %arg6[%c0_27, %c0_28], %34 {strides = array<i32>} : memref<1x16xf32, #tpu.memory_space<vmem>>, vector<1x16xf32>,
      %cst_29 = arith.constant 0.000000e+00 : f32
      %36 = vector.broadcast %cst_29 : f32 to vector<1x16xf32>
      %c0_30 = arith.constant 0 : index
      %c0_31 = arith.constant 0 : index
      %37 = vector.load %arg7[%c0_30, %c0_31] : memref<1x16xf32, #tpu.memory_space<vmem>>, vector<1x16xf32>
      tpu.vector_store %arg7[%c0_30, %c0_31], %36 {strides = array<i32>} : memref<1x16xf32, #tpu.memory_space<vmem>>, vector<1x16xf32>,
    } else {
    }
    %c0 = arith.constant 0 : index
    %c0_1 = arith.constant 0 : index
    %3 = vector.load %arg2[%c0, %c0_1] : memref<8x16xbf16, #tpu.memory_space<vmem>>, vector<8x16xbf16>
    %4 = arith.extf %3 : vector<8x16xbf16> to vector<8x16xf32>
    %c0_2 = arith.constant 0 : index
    %c0_3 = arith.constant 0 : index
    %5 = vector.load %arg3[%c0_2, %c0_3] : memref<8x16xf32, #tpu.memory_space<vmem>>, vector<8x16xf32>
    %cst = arith.constant 5.000000e-01 : f32
    %6 = vector.broadcast %cst : f32 to vector<8x16xf32>
    %7 = arith.mulf %6, %5 : vector<8x16xf32>
    %8 = math.tanh %7 : vector<8x16xf32>
    %cst_4 = arith.constant 5.000000e-01 : f32
    %9 = vector.broadcast %cst_4 : f32 to vector<8x16xf32>
    %10 = arith.mulf %9, %8 : vector<8x16xf32>
    %cst_5 = arith.constant 5.000000e-01 : f32
    %11 = vector.broadcast %cst_5 : f32 to vector<8x16xf32>
    %12 = arith.addf %10, %11 : vector<8x16xf32>
    %c0_6 = arith.constant 0 : index
    %c0_7 = arith.constant 0 : index
    %13 = vector.load %arg5[%c0_6, %c0_7] : memref<1x16xf32, #tpu.memory_space<vmem>>, vector<1x16xf32>
    %14 = arith.mulf %12, %4 : vector<8x16xf32>
    %cst_8 = arith.constant dense<0.000000e+00> : vector<16xf32>
    %15 = vector.multi_reduction <add>, %14, %cst_8 [0] : vector<8x16xf32> to vector<16xf32>
    %16 = vector.shape_cast %15 : vector<16xf32> to vector<1x16xf32>
    %17 = arith.addf %13, %16 : vector<1x16xf32>
    %c0_9 = arith.constant 0 : index
    %c0_10 = arith.constant 0 : index
    %18 = vector.load %arg5[%c0_9, %c0_10] : memref<1x16xf32, #tpu.memory_space<vmem>>, vector<1x16xf32>
    tpu.vector_store %arg5[%c0_9, %c0_10], %17 {strides = array<i32>} : memref<1x16xf32, #tpu.memory_space<vmem>>, vector<1x16xf32>,
    %c0_11 = arith.constant 0 : index
    %c0_12 = arith.constant 0 : index
    %19 = vector.load %arg6[%c0_11, %c0_12] : memref<1x16xf32, #tpu.memory_space<vmem>>, vector<1x16xf32>
    %cst_13 = arith.constant dense<0.000000e+00> : vector<16xf32>
    %20 = vector.multi_reduction <add>, %4, %cst_13 [0] : vector<8x16xf32> to vector<16xf32>
    %21 = vector.shape_cast %20 : vector<16xf32> to vector<1x16xf32>
    %22 = arith.addf %19, %21 : vector<1x16xf32>
    %c0_14 = arith.constant 0 : index
    %c0_15 = arith.constant 0 : index
    %23 = vector.load %arg6[%c0_14, %c0_15] : memref<1x16xf32, #tpu.memory_space<vmem>>, vector<1x16xf32>
    tpu.vector_store %arg6[%c0_14, %c0_15], %22 {strides = array<i32>} : memref<1x16xf32, #tpu.memory_space<vmem>>, vector<1x16xf32>,
    %c0_16 = arith.constant 0 : index
    %c0_17 = arith.constant 0 : index
    %24 = vector.load %arg7[%c0_16, %c0_17] : memref<1x16xf32, #tpu.memory_space<vmem>>, vector<1x16xf32>
    %cst_18 = arith.constant dense<0.000000e+00> : vector<16xf32>
    %25 = vector.multi_reduction <add>, %12, %cst_18 [0] : vector<8x16xf32> to vector<16xf32>
    %26 = vector.shape_cast %25 : vector<16xf32> to vector<1x16xf32>
    %27 = arith.addf %24, %26 : vector<1x16xf32>
    %c0_19 = arith.constant 0 : index
    %c0_20 = arith.constant 0 : index
    %28 = vector.load %arg7[%c0_19, %c0_20] : memref<1x16xf32, #tpu.memory_space<vmem>>, vector<1x16xf32>
    tpu.vector_store %arg7[%c0_19, %c0_20], %27 {strides = array<i32>} : memref<1x16xf32, #tpu.memory_space<vmem>>, vector<1x16xf32>,
    %c0_i32_21 = arith.constant 0 : i32
    %29 = arith.cmpi eq, %arg1, %c0_i32_21 : i32
    %30 = arith.extui %29 : i1 to i32
    %c0_i32_22 = arith.constant 0 : i32
    %31 = arith.cmpi ne, %30, %c0_i32_22 : i32
    scf.if %31 {
      %c0_23 = arith.constant 0 : index
      %c0_24 = arith.constant 0 : index
      %32 = vector.load %arg5[%c0_23, %c0_24] : memref<1x16xf32, #tpu.memory_space<vmem>>, vector<1x16xf32>
      %c0_25 = arith.constant 0 : index
      %c0_26 = arith.constant 0 : index
      %33 = vector.load %arg6[%c0_25, %c0_26] : memref<1x16xf32, #tpu.memory_space<vmem>>, vector<1x16xf32>
      %c0_27 = arith.constant 0 : index
      %c0_28 = arith.constant 0 : index
      %34 = vector.load %arg7[%c0_27, %c0_28] : memref<1x16xf32, #tpu.memory_space<vmem>>, vector<1x16xf32>
      %35 = arith.addf %33, %34 : vector<1x16xf32>
      %cst_29 = arith.constant 1.500000e+00 : f32
      %36 = vector.broadcast %cst_29 : f32 to vector<1x16xf32>
      %37 = arith.mulf %36, %32 : vector<1x16xf32>
      %38 = arith.subf %35, %37 : vector<1x16xf32>
      %cst_30 = arith.constant 1.000000e-16 : f32
      %39 = vector.broadcast %cst_30 : f32 to vector<1x16xf32>
      %40 = arith.addf %38, %39 : vector<1x16xf32>
      %cst_31 = arith.constant 1.250000e+00 : f32
      %41 = vector.broadcast %cst_31 : f32 to vector<1x16xf32>
      %42 = arith.mulf %41, %32 : vector<1x16xf32>
      %43 = arith.divf %42, %40 : vector<1x16xf32>
      %cst_32 = arith.constant 1.000000e+00 : f32
      %44 = vector.broadcast %cst_32 : f32 to vector<1x16xf32>
      %45 = arith.subf %44, %43 : vector<1x16xf32>
      %c0_33 = arith.constant 0 : index
      %c0_34 = arith.constant 0 : index
      %46 = vector.load %arg4[%c0_33, %c0_34] : memref<1x16xf32, #tpu.memory_space<vmem>>, vector<1x16xf32>
      tpu.vector_store %arg4[%c0_33, %c0_34], %45 {strides = array<i32>} : memref<1x16xf32, #tpu.memory_space<vmem>>, vector<1x16xf32>,
    } else {
    }
    return
  }
  func.func @transform_0(%arg0: i32, %arg1: i32) -> (i32, i32) {
    %c0_i32 = arith.constant 0 : i32
    return %arg1, %arg0 : i32, i32
  }
  func.func @transform_1(%arg0: i32, %arg1: i32) -> (i32, i32) {
    %c0_i32 = arith.constant 0 : i32
    return %arg1, %arg0 : i32, i32
  }
  func.func @transform_2(%arg0: i32, %arg1: i32) -> (i32, i32) {
    %c0_i32 = arith.constant 0 : i32
    %c0_i32_0 = arith.constant 0 : i32
    return %c0_i32, %arg0 : i32, i32
  }
}

</mosaic_0001>

<bundles_post_ra>
// kernel: tpu_custom_call.1
= control target key start
LH: loop header
LB: loop body
LE: loop exit
PB: predicated region body
PF: predicated region fallthrough
CT: control target
= control target key end

     0   :  { %7 = vsyncpa [#allocation6], 0  ;;  %s258_s0 = inlined_call_operand.hbm [shape: bf16[8,16], index: 0, kind: input, shape index: {}]   ;;  %s259_s1 = inlined_call_operand.hbm [shape: f32[8,16], index: 1, kind: input, shape index: {}]   ;;  %s260_s2 = inlined_call_operand.hbm [shape: f32[1,16], index: 2, kind: output, shape index: {}]  }
   0x1   :  { %8 = vsyncpa [#allocation9], 0 }
   0x2   :  { %9 = vsyncpa [#allocation7], 0  ;;  %s15_s11 = sshll.u32 %s258_s0, 4  ;;  %s220_s12 = smov [#allocation5]   ;;  %s16_s11 = int_to_ptr.hbm [resolvable:$true] %s15_s11 }
   0x3   :  { %s17_s13 = sshll.u32 %s220_s12, 4  ;;  %s26_s16 = sshll.u32 %s259_s1, 4  ;;  %s18_s13 = int_to_ptr.vmem [resolvable:$true] %s17_s13  ;;  %s27_s16 = int_to_ptr.hbm [resolvable:$true] %s26_s16 }
   0x4   :  { %20 = dma.hbm_to_vmem [thread:$0]  %s16_s11, 64, %s18_s13, [#allocation6]  }
   0x5   :  { %s221_s17 = smov [#allocation8]  }
   0x6   :  { %s28_s18 = sshll.u32 %s221_s17, 4  ;;  %s29_s18 = int_to_ptr.vmem [resolvable:$true] %s28_s18 }
   0x7   :  { %31 = dma.hbm_to_vmem [thread:$0]  %s27_s16, 128, %s29_s18, [#allocation9]  }
   0x8   :  { %214 = dma.done.wait [#allocation6], 64  }
   0x9   :  { %215 = vsyncadd [#allocation6], 4294967232 }
   0xa   :  { %216 = dma.done.wait [#allocation9], 128  }
   0xb   :  { %217 = vsyncadd [#allocation9], 4294967168  ;;  %vm44_vm0 = vcmask 122880   ;;  %v222_v0 = vmov 0.0   ;;  %v48_v1 = vld [vmem:[#allocation5] sm:$0xf] }
   0xc   :  { %45 = vst.msk [vmem:[#allocation2] sm:$0x1] %vm44_vm0, %v222_v0  ;;  %v50_v2 = vld [vmem:[#allocation8] sm:$0xff]  ;;  %vm57_vm1 = vcmask 130048   ;;  %v49_v3 = vunpack.c.l.bf16 %v48_v1  ;;  %s223_s0 = smov [#allocation10]   ;;  %s123_s21 = sshll.u32 %s260_s2, 4  ;;  %s124_s21 = int_to_ptr.hbm [resolvable:$true] %s123_s21 }
   0xd   :  { %46 = vst.msk [vmem:[#allocation3] sm:$0x1] %vm44_vm0, %v222_v0  ;;  %v51_v4 = vmul.f32 0.5, %v50_v2  ;;  %s121_s1 = sshll.u32 %s223_s0, 4  ;;  %s122_s1 = int_to_ptr.vmem [resolvable:$true] %s121_s1 }
   0xe   :  { %47 = vst.msk [vmem:[#allocation4] sm:$0x1] %vm44_vm0, %v222_v0  ;;  %v69_v5 = vsel %vm57_vm1, %v49_v3, 0.0 }
   0xf   :  { %138 = vtanh.f32 %v51_v4  ;;  %v70_v6 = vrot.slane %v69_v5, 4 }
  0x11   :  { %v71_v7 = vadd.f32 %v70_v6, %v69_v5 }
  0x13   :  { %v72_v8 = vrot.slane %v71_v7, 2  ;;  %v55_v32 = vld [vmem:[#allocation2] sm:$0x1] }
  0x14   :  { %v68_v14 = vld [vmem:[#allocation3] sm:$0x1] }
  0x15   :  { %v139_v9 = vpop.eup %138  ;;  %v73_v11 = vadd.f32 %v72_v8, %v71_v7  ;;  %v78_v29 = vld [vmem:[#allocation4] sm:$0x1] }
  0x16   :  { %v53_v10 = vmul.f32 0.5, %v139_v9 }
  0x17   :  { %v74_v13 = vrot.slane %v73_v11, 1 }
  0x18   :  { %v54_v12 = vadd.f32 0.5, %v53_v10 }
  0x19   :  { %v75_v16 = vadd.f32 %v74_v13, %v73_v11 }
  0x1a   :  { %v56_v15 = vmul.f32 %v54_v12, %v49_v3  ;;  %v79_v17 = vsel %vm57_vm1, %v54_v12, 0.0 }
  0x1b   :  { %v80_v18 = vrot.slane %v79_v17, 4  ;;  %v76_v20 = vadd.f32 %v75_v16, %v68_v14 }
  0x1c   :  { %v58_v19 = vsel %vm57_vm1, %v56_v15, 0.0 }
  0x1d   :  { %v59_v21 = vrot.slane %v58_v19, 4  ;;  %v81_v22 = vadd.f32 %v80_v18, %v79_v17  ;;  %77 = vst.msk [vmem:[#allocation3] sm:$0x1] %vm44_vm0, %v76_v20 }
  0x1f   :  { %v60_v23 = vadd.f32 %v59_v21, %v58_v19  ;;  %v82_v24 = vrot.slane %v81_v22, 2 }
  0x21   :  { %v61_v25 = vrot.slane %v60_v23, 2  ;;  %v83_v26 = vadd.f32 %v82_v24, %v81_v22 }
  0x23   :  { %v62_v27 = vadd.f32 %v61_v25, %v60_v23  ;;  %v84_v28 = vrot.slane %v83_v26, 1 }
  0x24   :  { %v92_v36 = vld [vmem:[#allocation3] sm:$0x1] }
  0x25   :  { %v63_v30 = vrot.slane %v62_v27, 1  ;;  %v85_v31 = vadd.f32 %v84_v28, %v83_v26 }
  0x27   :  { %v64_v33 = vadd.f32 %v63_v30, %v62_v27  ;;  %v86_v34 = vadd.f32 %v85_v31, %v78_v29 }
  0x29   :  { %v65_v35 = vadd.f32 %v64_v33, %v55_v32  ;;  %87 = vst.msk [vmem:[#allocation4] sm:$0x1] %vm44_vm0, %v86_v34 }
  0x2b   :  { %67 = vst.msk [vmem:[#allocation2] sm:$0x1] %vm44_vm0, %v65_v35 }
  0x30   :  { %v93_v37 = vld [vmem:[#allocation4] sm:$0x1] }
  0x31   :  { %v94_v38 = vadd.f32 %v93_v37, %v92_v36 }
  0x32   :  { %v91_v39 = vld [vmem:[#allocation2] sm:$0x1] }
  0x33   :  { %v95_v40 = vmul.f32 1.5, %v91_v39  ;;  %v98_v51 = vmul.f32 1.25, %v91_v39 }
  0x35   :  { %v96_v41 = vsub.f32 %v94_v38, %v95_v40 }
  0x37   :  { %v97_v42 = vadd.f32 1e-16, %v96_v41 }
  0x39   :  { %140 = vrcp.f32 %v97_v42  ;;  %v110_v46 = vand.u32 2147483648, %v97_v42  ;;  %v108_v48 = vand.u32 2147483647, %v97_v42  ;;  %vm104_vm3 = vweird.f32 %v97_v42 }
  0x3b   :  { %v111_v50 = vor.u32 1.1754944e-38, %v110_v46  ;;  %vm109_vm5 = vcmp.eq.f32.partialorder %v108_v48, 8.507059e+37 }
  0x3f   :  { %v141_v43 = vpop.eup %140 }
  0x40   :  { %v100_v44 = vmul.f32 %v141_v43, %v97_v42  ;;  %vm105_vm2 = vweird.f32 %v141_v43 }
  0x41   :  { %vm106_vm4 = vmor %vm104_vm3, %vm105_vm2 }
  0x42   :  { %v101_v45 = vsub.f32 1.0, %v100_v44 }
  0x44   :  { %v102_v47 = vmul.f32 %v141_v43, %v101_v45 }
  0x46   :  { %v103_v49 = vadd.f32 %v141_v43, %v102_v47 }
  0x48   :  { %v107_v52 = vsel %vm106_vm4, %v141_v43, %v103_v49 }
  0x49   :  { %v112_v53 = vsel %vm109_vm5, %v111_v50, %v107_v52 }
  0x4a   :  { %v113_v54 = vmul.f32 %v112_v53, %v98_v51 }
  0x4c   :  { %v114_v55 = vsub.f32 1.0, %v113_v54 }
  0x4e   :  { %115 = vst.msk [vmem:[#allocation10] sm:$0x1] %vm44_vm0, %v114_v55 }
  0x4f   :  { %126 = dma.vmem_to_hbm [thread:$0]  %s122_s1, 16, %s124_s21, [#allocation7]  }
  0x50   :  { %218 = dma.done.wait [#allocation7], 16  }
  0x51   :  { %219 = vsyncadd [#allocation7], 4294967280 }
  0x52   :  { %131 = vsyncpa [#allocation6], 1 }
  0x53   :  { %132 = vsyncpa [#allocation9], 1 }
  0x54   :  { %133 = vsyncpa [#allocation7], 1 }

</bundles_post_ra>
